<compile_context>
chip_gen: v7x
topology: tpu7x:2x2x1
jax: 0.10.0
libtpu: 0.0.40
codegen_flags: <defaults>
</compile_context>

<pallas_src>
from functools import partial

import jax
import jax.numpy as jnp
from jax.experimental import pallas as pl
from jax.experimental.pallas import tpu as pltpu

_LANE = 128                # lane width (fast axis)
_GROUP = 8 * _LANE         # one native (8,128) f32 tile = 1024 elements
_NEG_PAD = -1e9            # sigmoid(_NEG_PAD) == 0 exactly


def _dice_partial_kernel(x_ref, t_ref, inter_ref, den_ref):
    """One grid step: (groups, 8, 128) block -> two (8, 128) partial sums."""
    x = x_ref[...].astype(jnp.float32)          # (groups, 8, 128) logits
    t = t_ref[...].astype(jnp.float32)          # (groups, 8, 128) targets

    s = 0.5 * jnp.tanh(0.5 * x) + 0.5           # sigmoid via one EUP tanh

    # Leading-axis reductions are plain vreg adds (VPU), no cross-lane work.
    inter_ref[...] = jnp.sum(s * t, axis=0)     # (8, 128) partial intersection
    den_ref[...] = jnp.sum(s + t, axis=0)       # (8, 128) partial denominator


def dice_loss(inputs, target, smooth=1e-05, *, groups_per_tile=256):
    """Pallas dice loss. `inputs`/`target` may have any (identical) shape."""
    assert inputs.shape == target.shape
    x = inputs.reshape(-1).astype(jnp.float32)
    t = target.reshape(-1).astype(jnp.float32)
    n = x.shape[0]

    n_groups = -(-n // _GROUP)                               # ceil
    groups_per_tile = max(1, min(int(groups_per_tile), n_groups))
    n_tiles = -(-n_groups // groups_per_tile)                # ceil
    n_pad = n_tiles * groups_per_tile * _GROUP

    if n_pad != n:
        # Padding contributes exactly 0 to every sum (sigmoid(-1e9) == 0, t == 0).
        x = jnp.pad(x, (0, n_pad - n), constant_values=_NEG_PAD)
        t = jnp.pad(t, (0, n_pad - n), constant_values=0.0)

    x3 = x.reshape(n_tiles * groups_per_tile, 8, _LANE)
    t3 = t.reshape(n_tiles * groups_per_tile, 8, _LANE)

    inter_p, den_p = pl.pallas_call(
        _dice_partial_kernel,
        out_shape=(
            jax.ShapeDtypeStruct((n_tiles * 8, _LANE), jnp.float32),
            jax.ShapeDtypeStruct((n_tiles * 8, _LANE), jnp.float32),
        ),
        grid_spec=pltpu.PrefetchScalarGridSpec(
            num_scalar_prefetch=0,
            grid=(n_tiles,),
            in_specs=[
                pl.BlockSpec((groups_per_tile, 8, _LANE), lambda i: (i, 0, 0)),
                pl.BlockSpec((groups_per_tile, 8, _LANE), lambda i: (i, 0, 0)),
            ],
            out_specs=[
                pl.BlockSpec((8, _LANE), lambda i: (i, 0)),
                pl.BlockSpec((8, _LANE), lambda i: (i, 0)),
            ],
        ),
        compiler_params=pltpu.CompilerParams(
            dimension_semantics=("parallel",)),  # independent tiles -> megacore
    )(x3, t3)

    # Tiny final reduction + dice formula in plain JAX.
    intersection = jnp.sum(inter_p)
    denom = jnp.sum(den_p)
    dice = (2.0 * intersection + smooth) / (denom + smooth)
    return 1.0 - dice


def dice_loss_ref(inputs, target, smooth=1e-05):
    """Pure-JAX reference mirroring the PyTorch forward."""
    s = jax.nn.sigmoid(inputs.reshape(-1).astype(jnp.float32))
    t = target.reshape(-1).astype(jnp.float32)
    inter = jnp.sum(s * t)
    dice = (2.0 * inter + smooth) / (jnp.sum(s) + jnp.sum(t) + smooth)
    return 1.0 - dice


if __name__ == "__main__":
    # Small deterministic example: (B, C, H, W) logits + binary target mask.
    B, C, H, W = 2, 4, 16, 16
    key = jax.random.PRNGKey(0)
    k1, k2 = jax.random.split(key)
    logits = jax.random.normal(k1, (B, C, H, W), dtype=jnp.float32)
    target = jax.random.bernoulli(k2, 0.3, (B, C, H, W)).astype(jnp.float32)

    out = dice_loss(logits, target)
    out = jax.block_until_ready(out)

    ref = dice_loss_ref(logits, target)
    assert jnp.allclose(out, ref, rtol=1e-5, atol=1e-5), (out, ref)

    print("KERNEL_OK")
</pallas_src>

<mosaic_0001>
module attributes {stable_mosaic.version = 11 : i64} {
  func.func @_dice_partial_kernel(%arg0: i32, %arg1: memref<2x8x128xf32, #tpu.memory_space<vmem>>, %arg2: memref<2x8x128xf32, #tpu.memory_space<vmem>>, %arg3: memref<8x128xf32, #tpu.memory_space<vmem>>, %arg4: memref<8x128xf32, #tpu.memory_space<vmem>>) attributes {dimension_semantics = [#tpu.dimension_semantics<parallel>], iteration_bounds = array<i64: 1>, scalar_prefetch = 0 : i64, scratch_operands = 0 : i64, tpu.core_type = #tpu.core_type<tc>, window_params = [{transform_indices = @transform_0, window_bounds = array<i64: 2, 8, 128>}, {transform_indices = @transform_1, window_bounds = array<i64: 2, 8, 128>}, {transform_indices = @transform_2, window_bounds = array<i64: 8, 128>}, {transform_indices = @transform_3, window_bounds = array<i64: 8, 128>}]} {
    %c0 = arith.constant 0 : index
    %c0_0 = arith.constant 0 : index
    %c0_1 = arith.constant 0 : index
    %0 = vector.load %arg1[%c0, %c0_0, %c0_1] : memref<2x8x128xf32, #tpu.memory_space<vmem>>, vector<2x8x128xf32>
    %c0_2 = arith.constant 0 : index
    %c0_3 = arith.constant 0 : index
    %c0_4 = arith.constant 0 : index
    %1 = vector.load %arg2[%c0_2, %c0_3, %c0_4] : memref<2x8x128xf32, #tpu.memory_space<vmem>>, vector<2x8x128xf32>
    %cst = arith.constant 5.000000e-01 : f32
    %2 = vector.broadcast %cst : f32 to vector<2x8x128xf32>
    %3 = arith.mulf %2, %0 : vector<2x8x128xf32>
    %4 = math.tanh %3 : vector<2x8x128xf32>
    %cst_5 = arith.constant 5.000000e-01 : f32
    %5 = vector.broadcast %cst_5 : f32 to vector<2x8x128xf32>
    %6 = arith.mulf %5, %4 : vector<2x8x128xf32>
    %cst_6 = arith.constant 5.000000e-01 : f32
    %7 = vector.broadcast %cst_6 : f32 to vector<2x8x128xf32>
    %8 = arith.addf %6, %7 : vector<2x8x128xf32>
    %9 = arith.mulf %8, %1 : vector<2x8x128xf32>
    %cst_7 = arith.constant dense<0.000000e+00> : vector<8x128xf32>
    %10 = vector.multi_reduction <add>, %9, %cst_7 [0] : vector<2x8x128xf32> to vector<8x128xf32>
    %c0_8 = arith.constant 0 : index
    %c0_9 = arith.constant 0 : index
    %11 = vector.load %arg3[%c0_8, %c0_9] : memref<8x128xf32, #tpu.memory_space<vmem>>, vector<8x128xf32>
    tpu.vector_store %arg3[%c0_8, %c0_9], %10 {strides = array<i32>} : memref<8x128xf32, #tpu.memory_space<vmem>>, vector<8x128xf32>,
    %12 = arith.addf %8, %1 : vector<2x8x128xf32>
    %cst_10 = arith.constant dense<0.000000e+00> : vector<8x128xf32>
    %13 = vector.multi_reduction <add>, %12, %cst_10 [0] : vector<2x8x128xf32> to vector<8x128xf32>
    %c0_11 = arith.constant 0 : index
    %c0_12 = arith.constant 0 : index
    %14 = vector.load %arg4[%c0_11, %c0_12] : memref<8x128xf32, #tpu.memory_space<vmem>>, vector<8x128xf32>
    tpu.vector_store %arg4[%c0_11, %c0_12], %13 {strides = array<i32>} : memref<8x128xf32, #tpu.memory_space<vmem>>, vector<8x128xf32>,
    return
  }
  func.func @transform_0(%arg0: i32) -> (i32, i32, i32) {
    %c0_i32 = arith.constant 0 : i32
    %c0_i32_0 = arith.constant 0 : i32
    %c0_i32_1 = arith.constant 0 : i32
    return %arg0, %c0_i32, %c0_i32_0 : i32, i32, i32
  }
  func.func @transform_1(%arg0: i32) -> (i32, i32, i32) {
    %c0_i32 = arith.constant 0 : i32
    %c0_i32_0 = arith.constant 0 : i32
    %c0_i32_1 = arith.constant 0 : i32
    return %arg0, %c0_i32, %c0_i32_0 : i32, i32, i32
  }
  func.func @transform_2(%arg0: i32) -> (i32, i32) {
    %c0_i32 = arith.constant 0 : i32
    %c0_i32_0 = arith.constant 0 : i32
    return %arg0, %c0_i32 : i32, i32
  }
  func.func @transform_3(%arg0: i32) -> (i32, i32) {
    %c0_i32 = arith.constant 0 : i32
    %c0_i32_0 = arith.constant 0 : i32
    return %arg0, %c0_i32 : i32, i32
  }
}

</mosaic_0001>

<bundles_post_ra>
// kernel: tpu_custom_call.1
= control target key start
LH: loop header
LB: loop body
LE: loop exit
PB: predicated region body
PF: predicated region fallthrough
CT: control target
= control target key end

     0   :  { %9 = vsyncpa [#allocation3], 0  ;;  %s273_s0 = inlined_call_operand.hbm [shape: f32[2,8,128], index: 0, kind: input, shape index: {}]   ;;  %s274_s1 = inlined_call_operand.hbm [shape: f32[2,8,128], index: 1, kind: input, shape index: {}]   ;;  %s275_s2 = inlined_call_operand.hbm [shape: f32[8,128], index: 2, kind: output, shape index: {0}]   ;;  %s276_s3 = inlined_call_operand.hbm [shape: f32[8,128], index: 3, kind: output, shape index: {1}]  }
   0x1   :  { %10 = vsyncpa [#allocation6], 0 }
   0x2   :  { %11 = vsyncpa [#allocation4], 0 }
   0x3   :  { %12 = vsyncpa [#allocation9], 0  ;;  %s199_s12 = smov [#allocation2]   ;;  %s103_s16 = scalar_lea.hbm %s273_s0, 256 }
   0x4   :  { %s18_s13 = sshll.u32 %s199_s12, 4  ;;  %p104_p0 = scmp.ne.s32.totalorder %s273_s0, %s103_s16  ;;  %s19_s13 = int_to_ptr.vmem [resolvable:$true] %s18_s13 }
   0x5   :  { %p107_p1 = scmp.lt.u32.totalorder %s103_s16, %s273_s0 }
   0x7   :  { %p109_p2 = pnand %p107_p1, %p104_p0 }
   0x9   :  { %112 = shalt.err (!%p109_p2)
}
   0xa   :  { %s113_s21 = scalar_lea.vmem %s19_s13, 256  ;;  %p118_p4 = scmp.lt.s32.totalorder %s19_s13, %s19_s13 }
   0xb   :  { %p114_p3 = scmp.ne.s32.totalorder %s19_s13, %s113_s21  ;;  %p119_p5 = scmp.lt.s32.totalorder %s113_s21, %s113_s21 }
   0xd   :  { %p120_p6 = por %p119_p5, %p118_p4 }
   0xf   :  { %p121_p7 = pnand %p120_p6, %p114_p3 }
  0x11   :  { %124 = shalt.err (!%p121_p7)
}
  0x12   :  { %s200_s22 = smov 128   ;;  %s201_s23 = smov 8  }
  0x13   :  { %24 = dma.hbm_to_vmem [thread:$0]  %s273_s0, 256, %s19_s13, [#allocation3], %s200_s22, %s200_s22, %s201_s23  }
  0x14   :  { %s202_s26 = smov [#allocation5]   ;;  %s125_s30 = scalar_lea.hbm %s274_s1, 256 }
  0x15   :  { %s30_s27 = sshll.u32 %s202_s26, 4  ;;  %p126_p8 = scmp.ne.s32.totalorder %s274_s1, %s125_s30  ;;  %s31_s27 = int_to_ptr.vmem [resolvable:$true] %s30_s27 }
  0x16   :  { %p129_p9 = scmp.lt.u32.totalorder %s125_s30, %s274_s1 }
  0x18   :  { %p131_p10 = pnand %p129_p9, %p126_p8 }
  0x1a   :  { %134 = shalt.err (!%p131_p10)
}
  0x1b   :  { %s135_s8 = scalar_lea.vmem %s31_s27, 256  ;;  %p140_p12 = scmp.lt.s32.totalorder %s31_s27, %s31_s27 }
  0x1c   :  { %p136_p11 = scmp.ne.s32.totalorder %s31_s27, %s135_s8  ;;  %p141_p13 = scmp.lt.s32.totalorder %s135_s8, %s135_s8 }
  0x1e   :  { %p142_p0 = por %p141_p13, %p140_p12 }
  0x20   :  { %p143_p1 = pnand %p142_p0, %p136_p11 }
  0x22   :  { %146 = shalt.err (!%p143_p1)
}
  0x23   :  { %36 = dma.hbm_to_vmem [thread:$0]  %s274_s1, 256, %s31_s27, [#allocation6], %s200_s22, %s200_s22, %s201_s23  }
  0x24   :  { %191 = dma.done.wait [#allocation3], 256  }
  0x25   :  { %192 = vsyncadd [#allocation3], 4294967040 }
  0x26   :  { %193 = dma.done.wait [#allocation6], 256  }
  0x27   :  { %194 = vsyncadd [#allocation6], 4294967040  ;;  %v43_v0 = vld [vmem:[#allocation2] sm:$0xff]  ;;  %v44_v1 = vld [vmem:[#allocation2 + $0x8] sm:$0xff]  ;;  %s203_s1 = smov [#allocation7]   ;;  %s204_s11 = smov [#allocation8]  }
  0x28   :  { %v47_v2 = vmul.f32 0.5, %v43_v0  ;;  %v48_v3 = vmul.f32 0.5, %v44_v1  ;;  %v45_v7 = vld [vmem:[#allocation5] sm:$0xff]  ;;  %v46_v9 = vld [vmem:[#allocation5 + $0x8] sm:$0xff]  ;;  %s69_s10 = sshll.u32 %s203_s1, 4  ;;  %s79_s12 = sshll.u32 %s204_s11, 4  ;;  %s70_s10 = int_to_ptr.vmem [resolvable:$true] %s69_s10  ;;  %s80_s12 = int_to_ptr.vmem [resolvable:$true] %s79_s12 }
  0x29   :  { %s147_s13 = scalar_lea.vmem %s70_s10, 128  ;;  %p152_p3 = scmp.lt.s32.totalorder %s70_s10, %s70_s10 }
  0x2a   :  { %99 = vtanh.f32 %v47_v2  ;;  %p148_p2 = scmp.ne.s32.totalorder %s70_s10, %s147_s13  ;;  %p153_p4 = scmp.lt.s32.totalorder %s147_s13, %s147_s13 }
  0x2b   :  { %101 = vtanh.f32 %v48_v3 }
  0x2c   :  { %p154_p5 = por %p153_p4, %p152_p3 }
  0x2e   :  { %p155_p6 = pnand %p154_p5, %p148_p2 }
  0x34   :  { %v100_v4 = vpop.eup %99 }
  0x35   :  { %v102_v5 = vpop.eup %101  ;;  %v51_v6 = vmul.f32 0.5, %v100_v4 }
  0x36   :  { %v52_v8 = vmul.f32 0.5, %v102_v5 }
  0x37   :  { %v53_v10 = vadd.f32 0.5, %v51_v6 }
  0x38   :  { %v54_v11 = vadd.f32 0.5, %v52_v8 }
  0x39   :  { %v55_v12 = vmul.f32 %v53_v10, %v45_v7  ;;  %v59_v13 = vadd.f32 %v53_v10, %v45_v7 }
  0x3a   :  { %v56_v14 = vmul.f32 %v54_v11, %v46_v9  ;;  %v60_v15 = vadd.f32 %v54_v11, %v46_v9 }
  0x3c   :  { %v57_v16 = vadd.f32 %v56_v14, %v55_v12  ;;  %v61_v17 = vadd.f32 %v60_v15, %v59_v13 }
  0x3e   :  { %58 = vst [vmem:[#allocation7] sm:$0xff] %v57_v16  ;;  %62 = vst [vmem:[#allocation8] sm:$0xff] %v61_v17 }
  0x3f   :  { %158 = shalt.err (!%p155_p6)
}
  0x40   :  { %s159_s16 = scalar_lea.hbm %s275_s2, 128 }
  0x41   :  { %p160_p7 = scmp.ne.s32.totalorder %s275_s2, %s159_s16  ;;  %p163_p8 = scmp.lt.u32.totalorder %s159_s16, %s275_s2 }
  0x43   :  { %p165_p9 = pnand %p163_p8, %p160_p7 }
  0x45   :  { %168 = shalt.err (!%p165_p9)
}
  0x46   :  { %72 = dma.vmem_to_hbm [thread:$0]  %s70_s10, 128, %s275_s2, [#allocation4]  }
  0x47   :  { %s169_s23 = scalar_lea.vmem %s80_s12, 128  ;;  %p174_p11 = scmp.lt.s32.totalorder %s80_s12, %s80_s12 }
  0x48   :  { %p170_p10 = scmp.ne.s32.totalorder %s80_s12, %s169_s23  ;;  %p175_p12 = scmp.lt.s32.totalorder %s169_s23, %s169_s23 }
  0x4a   :  { %p176_p13 = por %p175_p12, %p174_p11 }
  0x4c   :  { %p177_p0 = pnand %p176_p13, %p170_p10 }
  0x4e   :  { %180 = shalt.err (!%p177_p0)
}
  0x4f   :  { %s181_s26 = scalar_lea.hbm %s276_s3, 128 }
  0x50   :  { %p182_p1 = scmp.ne.s32.totalorder %s276_s3, %s181_s26  ;;  %p185_p2 = scmp.lt.u32.totalorder %s181_s26, %s276_s3 }
  0x52   :  { %p187_p3 = pnand %p185_p2, %p182_p1 }
  0x54   :  { %190 = shalt.err (!%p187_p3)
}
  0x55   :  { %82 = dma.vmem_to_hbm [thread:$0]  %s80_s12, 128, %s276_s3, [#allocation9]  }
  0x56   :  { %195 = dma.done.wait [#allocation4], 128  }
  0x57   :  { %196 = vsyncadd [#allocation4], 4294967168 }
  0x58   :  { %197 = dma.done.wait [#allocation9], 128  }
  0x59   :  { %198 = vsyncadd [#allocation9], 4294967168 }
  0x5a   :  { %89 = vsyncpa [#allocation3], 1 }
  0x5b   :  { %90 = vsyncpa [#allocation6], 1 }
  0x5c   :  { %91 = vsyncpa [#allocation4], 1 }
  0x5d   :  { %92 = vsyncpa [#allocation9], 1 }

</bundles_post_ra>
